<compile_context>
chip_gen: v5e
topology: v5e:2x2
jax: 0.10.0
libtpu: 0.0.40
codegen_flags: <defaults>
</compile_context>

<pallas_src>
import jax
import jax.numpy as jnp
from jax.experimental import pallas as pl
from jax.experimental.pallas import tpu as pltpu

OUT_FEATURES = 3      # real Linear out_features
IN_FEATURES = 256     # real Linear in_features (flattened input size)
N_PAD = 128           # lane-dense padded output width


def fc_kernel(x_ref, w_ref, b_ref, o_ref):
    # x_ref: (TM, 256) f32
    # w_ref: (256, N_PAD) f32  -- (K, N) layout, cols 3..127 are zero
    # b_ref: (1, N_PAD) f32    -- zero-padded bias
    # o_ref: (TM, N_PAD) f32
    x = jnp.maximum(x_ref[...], 0.0)                       # ReLU (VPU, f32)
    acc = jnp.dot(x, w_ref[...],                           # MXU: (M,K) x (K,N)
                  preferred_element_type=jnp.float32)
    o_ref[...] = acc + b_ref[...]                          # lane-dense bias add + store


def init_fc_params(weight, bias):
    """One-time parameter prep (NOT in the per-call path).

    weight: (3, 256) torch layout; bias: (3,).
    Returns (256, 128) weight and (1, 128) bias, zero-padded on the N axis.
    """
    out_features, in_features = weight.shape
    w_pad = jnp.zeros((in_features, N_PAD), jnp.float32).at[:, :out_features].set(
        jnp.asarray(weight, jnp.float32).T)
    b_pad = jnp.zeros((1, N_PAD), jnp.float32).at[0, :out_features].set(
        jnp.asarray(bias, jnp.float32))
    return w_pad, b_pad


def fc_forward(x_nchw, w_pad, b_pad, *, tm=256):
    """x_nchw: (B, C, H, W) with C*H*W == 256; w_pad: (256, 128); b_pad: (1, 128)."""
    B = x_nchw.shape[0]
    K = w_pad.shape[0]

    # Flatten (row-major, identical semantics to torch.nn.Flatten on NCHW).
    x_flat = x_nchw.reshape(B, K).astype(jnp.float32)

    if B >= 2 * tm:
        # Large batch: tile over B, keep weight/bias VMEM-resident, parallel axis.
        Bp = pl.cdiv(B, tm) * tm
        if Bp != B:
            x_flat = jnp.pad(x_flat, ((0, Bp - B), (0, 0)))
        out_pad = pl.pallas_call(
            fc_kernel,
            out_shape=jax.ShapeDtypeStruct((Bp, N_PAD), jnp.float32),
            grid=(Bp // tm,),
            in_specs=[
                pl.BlockSpec((tm, K), lambda i: (i, 0)),
                pl.BlockSpec((K, N_PAD), lambda i: (0, 0)),
                pl.BlockSpec((1, N_PAD), lambda i: (0, 0)),
            ],
            out_specs=pl.BlockSpec((tm, N_PAD), lambda i: (i, 0)),
            compiler_params=pltpu.CompilerParams(
                dimension_semantics=("parallel",)),
        )(x_flat, w_pad, b_pad)
    else:
        # Small batch (e.g. B=2): single no-grid invocation, full-array blocks.
        out_pad = pl.pallas_call(
            fc_kernel,
            out_shape=jax.ShapeDtypeStruct((B, N_PAD), jnp.float32),
            in_specs=[
                pl.BlockSpec((B, K), lambda: (0, 0)),
                pl.BlockSpec((K, N_PAD), lambda: (0, 0)),
                pl.BlockSpec((1, N_PAD), lambda: (0, 0)),
            ],
            out_specs=pl.BlockSpec((B, N_PAD), lambda: (0, 0)),
        )(x_flat, w_pad, b_pad)

    # Slice the real logits back out in plain JAX.
    return out_pad[:B, :OUT_FEATURES]


def reference(x_nchw, weight, bias):
    B = x_nchw.shape[0]
    x_flat = x_nchw.reshape(B, -1)
    return jnp.maximum(x_flat, 0.0) @ weight.T + bias


if __name__ == "__main__":
    key = jax.random.PRNGKey(0)
    kx, kw, kb, kx2 = jax.random.split(key, 4)

    # Deterministic "Linear(256, 3)" parameters (uniform in +-1/sqrt(256), torch default init)
    bound = 1.0 / jnp.sqrt(256.0)
    weight = jax.random.uniform(kw, (OUT_FEATURES, IN_FEATURES),
                                minval=-bound, maxval=bound, dtype=jnp.float32)
    bias = jax.random.uniform(kb, (OUT_FEATURES,),
                              minval=-bound, maxval=bound, dtype=jnp.float32)

    # One-time (init) padded-parameter construction.
    w_pad, b_pad = init_fc_params(weight, bias)
    w_pad, b_pad = jax.block_until_ready((w_pad, b_pad))

    # --- Small-batch path (the module's typical use): (B=2, C=4, H=8, W=8) -> 256 features.
    x = jax.random.normal(kx, (2, 4, 8, 8), dtype=jnp.float32)
    out = jax.block_until_ready(fc_forward(x, w_pad, b_pad))
    ref = reference(x, weight, bias)
    assert out.shape == (2, OUT_FEATURES)
    assert jnp.allclose(out, ref, atol=1e-5, rtol=1e-5)

    # --- Large-batch path sanity check (exercises the batch-tiled grid).
    x_big = jax.random.normal(kx2, (1024, 4, 8, 8), dtype=jnp.float32)
    out_big = jax.block_until_ready(fc_forward(x_big, w_pad, b_pad))
    ref_big = reference(x_big, weight, bias)
    assert out_big.shape == (1024, OUT_FEATURES)
    assert jnp.allclose(out_big, ref_big, atol=1e-4, rtol=1e-4)

    print("KERNEL_OK")
</pallas_src>

<mosaic_0001>
module attributes {stable_mosaic.version = 11 : i64} {
  func.func @fc_kernel(%arg0: memref<2x256xf32, #tpu.memory_space<vmem>>, %arg1: memref<256x128xf32, #tpu.memory_space<vmem>>, %arg2: memref<1x128xf32, #tpu.memory_space<vmem>>, %arg3: memref<2x128xf32, #tpu.memory_space<vmem>>) attributes {dimension_semantics = [], scalar_prefetch = 0 : i64, scratch_operands = 0 : i64, tpu.core_type = #tpu.core_type<tc>} {
    %c0 = arith.constant 0 : index
    %c0_0 = arith.constant 0 : index
    %0 = vector.load %arg0[%c0, %c0_0] : memref<2x256xf32, #tpu.memory_space<vmem>>, vector<2x256xf32>
    %cst = arith.constant 0.000000e+00 : f32
    %1 = vector.broadcast %cst : f32 to vector<2x256xf32>
    %2 = arith.maximumf %0, %1 : vector<2x256xf32>
    %c0_1 = arith.constant 0 : index
    %c0_2 = arith.constant 0 : index
    %3 = vector.load %arg1[%c0_1, %c0_2] : memref<256x128xf32, #tpu.memory_space<vmem>>, vector<256x128xf32>
    %cst_3 = arith.constant dense<0.000000e+00> : vector<2x128xf32>
    %4 = tpu.matmul %2, %3, %cst_3 {dimension_numbers = #tpu.dot_dimension_numbers<[1], [0], [0], [1], [0, 0, 1, 1], [], []>} : vector<2x256xf32>, vector<256x128xf32>, vector<2x128xf32> -> vector<2x128xf32>
    %c0_4 = arith.constant 0 : index
    %c0_5 = arith.constant 0 : index
    %5 = vector.load %arg2[%c0_4, %c0_5] : memref<1x128xf32, #tpu.memory_space<vmem>>, vector<1x128xf32>
    %6 = vector.broadcast %5 : vector<1x128xf32> to vector<2x128xf32>
    %7 = arith.addf %4, %6 : vector<2x128xf32>
    %c0_6 = arith.constant 0 : index
    %c0_7 = arith.constant 0 : index
    %8 = vector.load %arg3[%c0_6, %c0_7] : memref<2x128xf32, #tpu.memory_space<vmem>>, vector<2x128xf32>
    tpu.vector_store %arg3[%c0_6, %c0_7], %7 {strides = array<i32>} : memref<2x128xf32, #tpu.memory_space<vmem>>, vector<2x128xf32>,
    return
  }
}

</mosaic_0001>

<bundles_post_ra>
// kernel: tpu_custom_call.1
= control target key start
LH: loop header
LB: loop body
LE: loop exit
PB: predicated region body
PF: predicated region fallthrough
CT: control target
= control target key end

     0   :  { %8 = vsyncpa [#allocation3], 0  ;;  %s269_s0 = inlined_call_operand.hbm [shape: f32[2,256], index: 0, kind: input, shape index: {}]   ;;  %s270_s1 = inlined_call_operand.hbm [shape: f32[256,128], index: 1, kind: input, shape index: {}]   ;;  %s271_s2 = inlined_call_operand.vmem [shape: f32[1,128], index: 2, kind: input, shape index: {}]   ;;  %s272_s3 = inlined_call_operand.hbm [shape: f32[2,128], index: 3, kind: output, shape index: {}]  }
   0x1   :  { %9 = vsyncpa [#allocation6], 0 }
   0x2   :  { %10 = vsyncpa [#allocation4], 0  ;;  %s16_s14 = sshll.u32 %s269_s0, 4  ;;  %s232_s15 = smov [#allocation2]   ;;  %s17_s14 = int_to_ptr.hbm [resolvable:$true] %s16_s14 }
   0x3   :  { %s18_s16 = sshll.u32 %s232_s15, 4  ;;  %s26_s19 = sshll.u32 %s270_s1, 4  ;;  %s19_s16 = int_to_ptr.vmem [resolvable:$true] %s18_s16  ;;  %s27_s19 = int_to_ptr.hbm [resolvable:$true] %s26_s19 }
   0x4   :  { %21 = dma.hbm_to_vmem [thread:$0]  %s17_s14, 64, %s19_s16, [#allocation3]  }
   0x5   :  { %s233_s20 = smov [#allocation5]   ;;  %s234_s22 = smov 128  }
   0x6   :  { %s28_s21 = sshll.u32 %s233_s20, 4  ;;  %s235_s23 = smov 8   ;;  %s29_s21 = int_to_ptr.vmem [resolvable:$true] %s28_s21 }
   0x7   :  { %34 = dma.hbm_to_vmem [thread:$0]  %s27_s19, 4096, %s29_s21, [#allocation6], %s234_s22, %s234_s22, %s235_s23  }
   0x8   :  { %226 = dma.done.wait [#allocation3], 64  }
   0x9   :  { %227 = vsyncadd [#allocation3], 4294967232 }
   0xa   :  { %228 = dma.done.wait [#allocation6], 4096  }
   0xb   :  { %229 = vsyncadd [#allocation6], 4294963200  ;;  %v62_v0 = vld [vmem:[#allocation5 + $0x78] sm:$0xff]  ;;  %v61_v1 = vld [vmem:[#allocation5 + $0x70] sm:$0xff]  ;;  %s236_s24 = smov [#allocation7]   ;;  %s137_s28 = sshll.u32 %s272_s3, 4  ;;  %s138_s28 = int_to_ptr.hbm [resolvable:$true] %s137_s28 }
   0xc   :  { %v78_v2 = vld [vmem:[#allocation5 + $0xf8] sm:$0xff]  ;;  %89 = vmatpush.msra.mxu0 %v62_v0  ;;  %v77_v3 = vld [vmem:[#allocation5 + $0xf0] sm:$0xff]  ;;  %v60_v4 = vld [vmem:[#allocation5 + $0x68] sm:$0xff]  ;;  %s135_s25 = sshll.u32 %s236_s24, 4  ;;  %s136_s25 = int_to_ptr.vmem [resolvable:$true] %s135_s25 }
   0xd   :  { %109 = vmatpush.msra.mxu1 %v78_v2  ;;  %v76_v5 = vld [vmem:[#allocation5 + $0xe8] sm:$0xff]  ;;  %v59_v6 = vld [vmem:[#allocation5 + $0x60] sm:$0xff]  ;;  %v58_v8 = vld [vmem:[#allocation5 + $0x58] sm:$0xff] }
   0xe   :  { %90 = vmatpush.msra.mxu0 %v61_v1  ;;  %v75_v7 = vld [vmem:[#allocation5 + $0xe0] sm:$0xff]  ;;  %v74_v9 = vld [vmem:[#allocation5 + $0xd8] sm:$0xff]  ;;  %v57_v10 = vld [vmem:[#allocation5 + $0x50] sm:$0xff] }
   0xf   :  { %110 = vmatpush.msra.mxu1 %v77_v3  ;;  %v73_v11 = vld [vmem:[#allocation5 + $0xd0] sm:$0xff]  ;;  %v56_v12 = vld [vmem:[#allocation5 + $0x48] sm:$0xff]  ;;  %v45_v14 = vld [vmem:[#allocation2] sm:$0xf] }
  0x10   :  { %91 = vmatpush.msra.mxu0 %v60_v4  ;;  %v72_v13 = vld [vmem:[#allocation5 + $0xc8] sm:$0xff]  ;;  %v46_v15 = vmax.f32 %v45_v14, 0.0  ;;  %v55_v16 = vld [vmem:[#allocation5 + $0x40] sm:$0xff]  ;;  %v54_v18 = vld [vmem:[#allocation5 + $0x38] sm:$0xff] }
  0x11   :  { %111 = vmatpush.msra.mxu1 %v76_v5  ;;  %v71_v17 = vld [vmem:[#allocation5 + $0xc0] sm:$0xff]  ;;  %v70_v19 = vld [vmem:[#allocation5 + $0xb8] sm:$0xff]  ;;  %v53_v20 = vld [vmem:[#allocation5 + $0x30] sm:$0xff] }
  0x12   :  { %92 = vmatpush.msra.mxu0 %v59_v6  ;;  %84 = vst [vmem:[#allocation1] ss:$4 sm:$0xff] %v46_v15  ;;  %v69_v21 = vld [vmem:[#allocation5 + $0xb0] sm:$0xff]  ;;  %v52_v22 = vld [vmem:[#allocation5 + $0x28] sm:$0xff]  ;;  %v51_v24 = vld [vmem:[#allocation5 + $0x20] sm:$0xff] }
  0x13   :  { %112 = vmatpush.msra.mxu1 %v75_v7  ;;  %v68_v23 = vld [vmem:[#allocation5 + $0xa8] sm:$0xff]  ;;  %v67_v25 = vld [vmem:[#allocation5 + $0xa0] sm:$0xff]  ;;  %v50_v26 = vld [vmem:[#allocation5 + $0x18] sm:$0xff] }
  0x14   :  { %93 = vmatpush.msra.mxu0 %v58_v8  ;;  %v66_v27 = vld [vmem:[#allocation5 + $0x98] sm:$0xff]  ;;  %v49_v28 = vld [vmem:[#allocation5 + $0x10] sm:$0xff]  ;;  %v48_v30 = vld [vmem:[#allocation5 + $0x8] sm:$0xff] }
  0x15   :  { %113 = vmatpush.msra.mxu1 %v74_v9  ;;  %v65_v29 = vld [vmem:[#allocation5 + $0x90] sm:$0xff]  ;;  %v64_v31 = vld [vmem:[#allocation5 + $0x88] sm:$0xff]  ;;  %v47_v32 = vld [vmem:[#allocation5] sm:$0xff] }
  0x16   :  { %94 = vmatpush.msra.mxu0 %v57_v10  ;;  %v63_v33 = vld [vmem:[#allocation5 + $0x80] sm:$0xff]  ;;  %v153_v36 = vld [vmem:[%s271_s2] ss:$0 sm:$0xff] }
  0x17   :  { %114 = vmatpush.msra.mxu1 %v73_v11 }
  0x18   :  { %95 = vmatpush.msra.mxu0 %v56_v12 }
  0x19   :  { %115 = vmatpush.msra.mxu1 %v72_v13  ;;  %v85_v34 = vld.sshfl [vmem:[#allocation1] sm:$0xff pattern:$0x73625140]  ;;  %v86_v35 = vld.sshfl [vmem:[#allocation1 + $0x8] sm:$0xff pattern:$0x73625140] }
  0x1a   :  { %96 = vmatpush.msra.mxu0 %v55_v16 }
  0x1b   :  { %116 = vmatpush.msra.mxu1 %v71_v17 }
  0x1c   :  { %97 = vmatpush.msra.mxu0 %v54_v18 }
  0x1d   :  { %117 = vmatpush.msra.mxu1 %v70_v19 }
  0x1e   :  { %98 = vmatpush.msra.mxu0 %v53_v20 }
  0x1f   :  { %118 = vmatpush.msra.mxu1 %v69_v21 }
  0x20   :  { %99 = vmatpush.msra.mxu0 %v52_v22 }
  0x21   :  { %119 = vmatpush.msra.mxu1 %v68_v23 }
  0x22   :  { %100 = vmatpush.msra.mxu0 %v51_v24 }
  0x23   :  { %120 = vmatpush.msra.mxu1 %v67_v25 }
  0x24   :  { %101 = vmatpush.msra.mxu0 %v50_v26 }
  0x25   :  { %121 = vmatpush.msra.mxu1 %v66_v27 }
  0x26   :  { %102 = vmatpush.msra.mxu0 %v49_v28 }
  0x27   :  { %122 = vmatpush.msra.mxu1 %v65_v29 }
  0x28   :  { %103 = vmatpush.msra.mxu0 %v48_v30 }
  0x29   :  { %123 = vmatpush.msra.mxu1 %v64_v31 }
  0x2a   :  { %104 = vmatpush.msra.mxu0 %v47_v32 }
  0x2b   :  { %124 = vmatpush.msra.mxu1 %v63_v33  ;;  %105 = vmatmul.f32.vlgmr.msra.gmra.mxu0 %v85_v34 }
  0x2c   :  { %125 = vmatmul.f32.vlgmr.msra.gmra.mxu1 %v86_v35 }
  0xa8   :  { %v106_v37 = vpop.f32.mrf.mxu0 }
  0xa9   :  { %v126_v38 = vpop.f32.mrf.mxu1  ;;  %v107_v39 = vadd.f32 %v153_v36, %v106_v37 }
  0xab   :  { %v127_v40 = vadd.f32 %v126_v38, %v107_v39 }
  0xad   :  { %129 = vst [vmem:[#allocation7] sm:$0x3] %v127_v40 }
  0xae   :  { %140 = dma.vmem_to_hbm [thread:$0]  %s136_s25, 32, %s138_s28, [#allocation4]  }
  0xaf   :  { %230 = dma.done.wait [#allocation4], 32  }
  0xb0   :  { %231 = vsyncadd [#allocation4], 4294967264 }
  0xb1   :  { %145 = vsyncpa [#allocation3], 1 }
  0xb2   :  { %146 = vsyncpa [#allocation6], 1 }
  0xb3   :  { %147 = vsyncpa [#allocation4], 1 }

</bundles_post_ra>
